<compile_context>
chip_gen: v7x
topology: tpu7x:2x2x1
jax: 0.10.0
libtpu: 0.0.40
codegen_flags: <defaults>
</compile_context>

<pallas_src>
import functools

import jax
import jax.numpy as jnp
import numpy as np
from jax.experimental import pallas as pl
from jax.experimental.pallas import tpu as pltpu

# Fixed architecture constants from the module.
K, S = 4, 2          # conv kernel size / stride
C1_OUT, C2_OUT = 16, 32
N_TAP = K * K


def _round_up(n, m):
    return ((n + m - 1) // m) * m


def _batch_tiling(B):
    """Batch tile TB (multiple of 8) and padded batch Bp (multiple of TB)."""
    if B <= 16:
        tb = _round_up(B, 8)                       # single grid step
    else:
        # Aim for >= 2 grid steps (v7x has 2 TensorCores); cap TB so the
        # fully-unrolled in-kernel intermediates stay vreg/VMEM friendly.
        tb = min(32, _round_up(-(-B // 2), 8))
    bp = _round_up(B, tb)
    return tb, bp


def _tree_sum(xs):
    """Pairwise tree reduction (shorter serial VPU add chain than a fold)."""
    while len(xs) > 1:
        nxt = [xs[i] + xs[i + 1] for i in range(0, len(xs) - 1, 2)]
        if len(xs) % 2:
            nxt.append(xs[-1])
        xs = nxt
    return xs[0]


# ----------------------------------------------------------------------------
# Fused kernel: TB batch elements per grid step.
#   conv1 (one big matmul) -> ReLU ->
#   conv2 (16 tap dots on contiguous row blocks, tree-reduced) -> ReLU ->
#   flatten+linear (M2 per-position dots with M=TB rows, tree-reduced) -> ReLU
# Row layout of p_ref / y1:  row = (tap*M2 + m2)*TB + b  (batch is minor).
# ----------------------------------------------------------------------------
def _mini_cnn_kernel(p_ref, w1_ref, b1_ref, w2_ref, b2_ref, w3_ref, b3_ref,
                     o_ref):
    f32, bf16 = jnp.float32, jnp.bfloat16
    n_slots, TB, ckk = p_ref.shape
    n_tap = w2_ref.shape[0]
    m2 = w3_ref.shape[0]
    blk = (n_slots // n_tap) * TB        # rows per tap block == m2 * TB

    # ---- Conv1: ONE MXU matmul over all (tap, position, batch) rows.
    p = p_ref[...].reshape(n_slots * TB, ckk)          # leading-dim merge only
    y1 = jnp.dot(p, w1_ref[...], preferred_element_type=f32)
    y1 = jnp.maximum(y1 + b1_ref[...], 0.0).astype(bf16)      # (n_slots*TB, 16)

    # ---- Conv2: 16 tap dots on contiguous, tile-aligned row blocks.
    parts = [
        jnp.dot(y1[t * blk:(t + 1) * blk, :], w2_ref[t],
                preferred_element_type=f32)
        for t in range(n_tap)
    ]
    y2 = jnp.maximum(_tree_sum(parts) + b2_ref[...], 0.0)     # (m2*TB, 32) f32
    y2 = y2.astype(bf16)

    # ---- Flatten (PyTorch (c2, i2, j2) order folded into w3) + Linear.
    outs = [
        jnp.dot(y2[m * TB:(m + 1) * TB, :], w3_ref[m],
                preferred_element_type=f32)
        for m in range(m2)
    ]
    # Lane-dense (TB, out_pad) store; padded columns are zero weight/bias.
    o_ref[...] = jnp.maximum(_tree_sum(outs) + b3_ref[...], 0.0)


# ----------------------------------------------------------------------------
# One-time parameter layout prep (hoisted out of the hot path).
# ----------------------------------------------------------------------------
def prepare_params(params, input_dims):
    w1, b1, w2, b2, w3, b3 = params
    C, H, W = input_dims
    OH1, OW1 = (H - K) // S + 1, (W - K) // S + 1
    OH2, OW2 = (OH1 - K) // S + 1, (OW1 - K) // S + 1
    M2 = OH2 * OW2
    ckk = C * K * K
    out_dim = w3.shape[0]
    out_pad = _round_up(out_dim, 128)              # lane-dense output width

    w1m = jnp.asarray(w1).reshape(C1_OUT, ckk).T.astype(jnp.bfloat16)  # (ckk,16)
    # conv2 weights per tap: (n_tap, c1, c2)
    w2t = jnp.transpose(jnp.asarray(w2), (2, 3, 1, 0)).reshape(
        N_TAP, C1_OUT, C2_OUT).astype(jnp.bfloat16)
    # Linear weight regrouped per conv2 spatial position; PyTorch flatten of
    # (C2, OH2, OW2) is c2-major -> flat index c2*M2 + m2.  Pad out_dim -> 128.
    w3t = jnp.asarray(w3).reshape(out_dim, C2_OUT, M2).transpose(2, 1, 0)
    w3t = jnp.pad(w3t, ((0, 0), (0, 0), (0, out_pad - out_dim)))
    w3t = w3t.astype(jnp.bfloat16)                                     # (M2,32,out_pad)

    b1r = jnp.asarray(b1).reshape(1, C1_OUT).astype(jnp.float32)
    b2r = jnp.asarray(b2).reshape(1, C2_OUT).astype(jnp.float32)
    b3r = jnp.pad(jnp.asarray(b3).astype(jnp.float32),
                  (0, out_pad - out_dim)).reshape(1, out_pad)
    return (w1m, b1r, w2t, b2r, w3t, b3r)


# ----------------------------------------------------------------------------
# Forward pass (fused Pallas hot path; weights already laid out)
# ----------------------------------------------------------------------------
@functools.partial(jax.jit, static_argnames=("out_dim",))
def mini_cnn_forward(x, prepped, *, out_dim):
    w1m, b1r, w2t, b2r, w3t, b3r = prepped
    x = x.astype(jnp.float32)
    B, C, H, W = x.shape
    OH1, OW1 = (H - K) // S + 1, (W - K) // S + 1
    OH2, OW2 = (OH1 - K) // S + 1, (OW1 - K) // S + 1
    M2 = OH2 * OW2
    ckk = C * K * K
    n_slots = N_TAP * M2
    out_pad = w3t.shape[2]

    TB, Bp = _batch_tiling(B)
    n_steps = Bp // TB

    # conv1 im2col as ONE fused XLA op, channels-last features (ci, kh, kw).
    pat = jax.lax.conv_general_dilated_patches(
        x, filter_shape=(K, K), window_strides=(S, S), padding="VALID",
        dimension_numbers=("NCHW", "OIHW", "NHWC"))        # (B, OH1, OW1, ckk)
    pat = pat.reshape(B, OH1 * OW1, ckk)

    # Duplicate/reorder conv1 positions into the (tap, conv2-position) slot
    # order the kernel consumes: slot = (kh*K+kw)*M2 + (i2*OW2 + j2) selects
    # conv1 position (S*i2+kh)*OW1 + (S*j2+kw).  Batch becomes the minor row
    # index so tap / position blocks are contiguous inside the kernel.
    idx = np.empty((n_slots,), np.int32)
    for kh in range(K):
        for kw in range(K):
            t = kh * K + kw
            for i2 in range(OH2):
                for j2 in range(OW2):
                    idx[t * M2 + i2 * OW2 + j2] = (S * i2 + kh) * OW1 + (S * j2 + kw)
    p2 = jnp.take(pat, jnp.asarray(idx), axis=1)            # (B, n_slots, ckk)
    p2 = jnp.transpose(p2, (1, 0, 2))                       # (n_slots, B, ckk)
    p2 = jnp.pad(p2, ((0, 0), (0, Bp - B), (0, 0))).astype(jnp.bfloat16)

    flops = 2 * Bp * (n_slots * ckk * C1_OUT
                      + M2 * N_TAP * C1_OUT * C2_OUT
                      + M2 * C2_OUT * out_pad)
    bytes_accessed = (p2.size * 2
                      + (w1m.size + w2t.size + w3t.size) * 2
                      + (b1r.size + b2r.size + b3r.size) * 4
                      + Bp * out_pad * 4)

    out = pl.pallas_call(
        _mini_cnn_kernel,
        out_shape=jax.ShapeDtypeStruct((Bp, out_pad), jnp.float32),
        grid=(n_steps,),
        in_specs=[
            pl.BlockSpec((n_slots, TB, ckk), lambda i: (0, i, 0)),        # patches
            pl.BlockSpec((ckk, C1_OUT), lambda i: (0, 0)),                # w1
            pl.BlockSpec((1, C1_OUT), lambda i: (0, 0)),                  # b1
            pl.BlockSpec((N_TAP, C1_OUT, C2_OUT), lambda i: (0, 0, 0)),   # w2
            pl.BlockSpec((1, C2_OUT), lambda i: (0, 0)),                  # b2
            pl.BlockSpec((M2, C2_OUT, out_pad), lambda i: (0, 0, 0)),     # w3
            pl.BlockSpec((1, out_pad), lambda i: (0, 0)),                 # b3
        ],
        out_specs=pl.BlockSpec((TB, out_pad), lambda i: (i, 0)),
        compiler_params=pltpu.CompilerParams(
            dimension_semantics=("parallel",),   # batch tiles across TCs (v7x)
            vmem_limit_bytes=16 << 20),          # deliberate headroom, << 64 MiB
        cost_estimate=pl.CostEstimate(
            flops=flops, transcendentals=0, bytes_accessed=bytes_accessed),
    )(p2, w1m, b1r, w2t, b2r, w3t, b3r)

    return out[:B, :out_dim]


# ----------------------------------------------------------------------------
# Pure-JAX reference for the correctness check
# ----------------------------------------------------------------------------
def ref_forward(x, params):
    w1, b1, w2, b2, w3, b3 = params
    x = x.astype(jnp.float32)
    dn = ("NCHW", "OIHW", "NCHW")
    y = jax.lax.conv_general_dilated(x, w1, (2, 2), "VALID", dimension_numbers=dn)
    y = jnp.maximum(y + b1[None, :, None, None], 0.0)
    y = jax.lax.conv_general_dilated(y, w2, (2, 2), "VALID", dimension_numbers=dn)
    y = jnp.maximum(y + b2[None, :, None, None], 0.0)
    y = y.reshape(y.shape[0], -1)
    return jnp.maximum(y @ w3.T + b3, 0.0)


if __name__ == "__main__":
    # Small shapes consistent with the module: input_dims = [4, 16, 16]
    B, C, H, W = 2, 4, 16, 16
    output_dim = 64

    key = jax.random.PRNGKey(0)
    kx, k1, k2, k3, k4, k5, k6 = jax.random.split(key, 7)
    x = jax.random.normal(kx, (B, C, H, W), dtype=jnp.float32)

    def uinit(k, shape, fan_in):
        bound = 1.0 / float(np.sqrt(fan_in))
        return jax.random.uniform(k, shape, jnp.float32, -bound, bound)

    w1 = uinit(k1, (16, C, 4, 4), C * 4 * 4)           # Conv2d(C, 16, 4, s=2)
    b1 = uinit(k2, (16,), C * 4 * 4)
    w2 = uinit(k3, (32, 16, 4, 4), 16 * 4 * 4)         # Conv2d(16, 32, 4, s=2)
    b2 = uinit(k4, (32,), 16 * 4 * 4)

    OH1 = (H - 4) // 2 + 1
    OW1 = (W - 4) // 2 + 1
    OH2 = (OH1 - 4) // 2 + 1
    OW2 = (OW1 - 4) // 2 + 1
    flat_dim = 32 * OH2 * OW2                          # = 128 for 16x16 input

    w3 = uinit(k5, (output_dim, flat_dim), flat_dim)   # Linear(flat_dim, 64)
    b3 = uinit(k6, (output_dim,), flat_dim)
    params = (w1, b1, w2, b2, w3, b3)

    # One-time layout prep, then the fused forward.
    prepped = prepare_params(params, (C, H, W))
    out = jax.block_until_ready(mini_cnn_forward(x, prepped, out_dim=output_dim))
    ref = jax.block_until_ready(ref_forward(x, params))

    assert out.shape == (B, output_dim), out.shape
    err = float(jnp.max(jnp.abs(out - ref)))
    # bf16 MXU operands with f32 accumulation: tolerance relaxed deliberately.
    assert err < 2e-2, err
    print("KERNEL_OK")
</pallas_src>

<mosaic_0001>
module attributes {stable_mosaic.version = 11 : i64} {
  func.func @_mini_cnn_kernel(%arg0: i32, %arg1: memref<64x8x64xbf16, #tpu.memory_space<vmem>>, %arg2: memref<64x16xbf16, #tpu.memory_space<vmem>>, %arg3: memref<1x16xf32, #tpu.memory_space<vmem>>, %arg4: memref<16x16x32xbf16, #tpu.memory_space<vmem>>, %arg5: memref<1x32xf32, #tpu.memory_space<vmem>>, %arg6: memref<4x32x128xbf16, #tpu.memory_space<vmem>>, %arg7: memref<1x128xf32, #tpu.memory_space<vmem>>, %arg8: memref<8x128xf32, #tpu.memory_space<vmem>>) attributes {dimension_semantics = [#tpu.dimension_semantics<parallel>], iteration_bounds = array<i64: 1>, scalar_prefetch = 0 : i64, scratch_operands = 0 : i64, tpu.core_type = #tpu.core_type<tc>, window_params = [{transform_indices = @transform_0, window_bounds = array<i64: 64, 8, 64>}, {pipeline_mode = #tpu.pipeline_mode<synchronous>, transform_indices = @transform_1, window_bounds = array<i64: 64, 16>}, {pipeline_mode = #tpu.pipeline_mode<synchronous>, transform_indices = @transform_2, window_bounds = array<i64: 1, 16>}, {pipeline_mode = #tpu.pipeline_mode<synchronous>, transform_indices = @transform_3, window_bounds = array<i64: 16, 16, 32>}, {pipeline_mode = #tpu.pipeline_mode<synchronous>, transform_indices = @transform_4, window_bounds = array<i64: 1, 32>}, {pipeline_mode = #tpu.pipeline_mode<synchronous>, transform_indices = @transform_5, window_bounds = array<i64: 4, 32, 128>}, {pipeline_mode = #tpu.pipeline_mode<synchronous>, transform_indices = @transform_6, window_bounds = array<i64: 1, 128>}, {transform_indices = @transform_7, window_bounds = array<i64: 8, 128>}]} {
    %c0 = arith.constant 0 : index
    %c0_0 = arith.constant 0 : index
    %c0_1 = arith.constant 0 : index
    %0 = vector.load %arg1[%c0, %c0_0, %c0_1] : memref<64x8x64xbf16, #tpu.memory_space<vmem>>, vector<64x8x64xbf16>
    %1 = vector.shape_cast %0 : vector<64x8x64xbf16> to vector<512x64xbf16>
    %c0_2 = arith.constant 0 : index
    %c0_3 = arith.constant 0 : index
    %2 = vector.load %arg2[%c0_2, %c0_3] : memref<64x16xbf16, #tpu.memory_space<vmem>>, vector<64x16xbf16>
    %cst = arith.constant dense<0.000000e+00> : vector<512x16xf32>
    %3 = tpu.matmul %1, %2, %cst {dimension_numbers = #tpu.dot_dimension_numbers<[1], [0], [0], [1], [0, 0, 1, 1], [], []>} : vector<512x64xbf16>, vector<64x16xbf16>, vector<512x16xf32> -> vector<512x16xf32>
    %c0_4 = arith.constant 0 : index
    %c0_5 = arith.constant 0 : index
    %4 = vector.load %arg3[%c0_4, %c0_5] : memref<1x16xf32, #tpu.memory_space<vmem>>, vector<1x16xf32>
    %5 = vector.broadcast %4 : vector<1x16xf32> to vector<512x16xf32>
    %6 = arith.addf %3, %5 : vector<512x16xf32>
    %cst_6 = arith.constant 0.000000e+00 : f32
    %7 = vector.broadcast %cst_6 : f32 to vector<512x16xf32>
    %8 = arith.maximumf %6, %7 : vector<512x16xf32>
    %9 = arith.truncf %8 : vector<512x16xf32> to vector<512x16xbf16>
    %10 = vector.extract_strided_slice %9 {offsets = [0, 0], sizes = [32, 16], strides = [1, 1]} : vector<512x16xbf16> to vector<32x16xbf16>
    %c0_7 = arith.constant 0 : index
    %c0_8 = arith.constant 0 : index
    %c0_9 = arith.constant 0 : index
    %11 = vector.load %arg4[%c0_7, %c0_8, %c0_9] : memref<16x16x32xbf16, #tpu.memory_space<vmem>>, vector<1x16x32xbf16>
    %12 = vector.shape_cast %11 : vector<1x16x32xbf16> to vector<16x32xbf16>
    %cst_10 = arith.constant dense<0.000000e+00> : vector<32x32xf32>
    %13 = tpu.matmul %10, %12, %cst_10 {dimension_numbers = #tpu.dot_dimension_numbers<[1], [0], [0], [1], [0, 0, 1, 1], [], []>} : vector<32x16xbf16>, vector<16x32xbf16>, vector<32x32xf32> -> vector<32x32xf32>
    %14 = vector.extract_strided_slice %9 {offsets = [32, 0], sizes = [32, 16], strides = [1, 1]} : vector<512x16xbf16> to vector<32x16xbf16>
    %c1 = arith.constant 1 : index
    %c0_11 = arith.constant 0 : index
    %c0_12 = arith.constant 0 : index
    %15 = vector.load %arg4[%c1, %c0_11, %c0_12] : memref<16x16x32xbf16, #tpu.memory_space<vmem>>, vector<1x16x32xbf16>
    %16 = vector.shape_cast %15 : vector<1x16x32xbf16> to vector<16x32xbf16>
    %cst_13 = arith.constant dense<0.000000e+00> : vector<32x32xf32>
    %17 = tpu.matmul %14, %16, %cst_13 {dimension_numbers = #tpu.dot_dimension_numbers<[1], [0], [0], [1], [0, 0, 1, 1], [], []>} : vector<32x16xbf16>, vector<16x32xbf16>, vector<32x32xf32> -> vector<32x32xf32>
    %18 = vector.extract_strided_slice %9 {offsets = [64, 0], sizes = [32, 16], strides = [1, 1]} : vector<512x16xbf16> to vector<32x16xbf16>
    %c2 = arith.constant 2 : index
    %c0_14 = arith.constant 0 : index
    %c0_15 = arith.constant 0 : index
    %19 = vector.load %arg4[%c2, %c0_14, %c0_15] : memref<16x16x32xbf16, #tpu.memory_space<vmem>>, vector<1x16x32xbf16>
    %20 = vector.shape_cast %19 : vector<1x16x32xbf16> to vector<16x32xbf16>
    %cst_16 = arith.constant dense<0.000000e+00> : vector<32x32xf32>
    %21 = tpu.matmul %18, %20, %cst_16 {dimension_numbers = #tpu.dot_dimension_numbers<[1], [0], [0], [1], [0, 0, 1, 1], [], []>} : vector<32x16xbf16>, vector<16x32xbf16>, vector<32x32xf32> -> vector<32x32xf32>
    %22 = vector.extract_strided_slice %9 {offsets = [96, 0], sizes = [32, 16], strides = [1, 1]} : vector<512x16xbf16> to vector<32x16xbf16>
    %c3 = arith.constant 3 : index
    %c0_17 = arith.constant 0 : index
    %c0_18 = arith.constant 0 : index
    %23 = vector.load %arg4[%c3, %c0_17, %c0_18] : memref<16x16x32xbf16, #tpu.memory_space<vmem>>, vector<1x16x32xbf16>
    %24 = vector.shape_cast %23 : vector<1x16x32xbf16> to vector<16x32xbf16>
    %cst_19 = arith.constant dense<0.000000e+00> : vector<32x32xf32>
    %25 = tpu.matmul %22, %24, %cst_19 {dimension_numbers = #tpu.dot_dimension_numbers<[1], [0], [0], [1], [0, 0, 1, 1], [], []>} : vector<32x16xbf16>, vector<16x32xbf16>, vector<32x32xf32> -> vector<32x32xf32>
    %26 = vector.extract_strided_slice %9 {offsets = [128, 0], sizes = [32, 16], strides = [1, 1]} : vector<512x16xbf16> to vector<32x16xbf16>
    %c4 = arith.constant 4 : index
    %c0_20 = arith.constant 0 : index
    %c0_21 = arith.constant 0 : index
    %27 = vector.load %arg4[%c4, %c0_20, %c0_21] : memref<16x16x32xbf16, #tpu.memory_space<vmem>>, vector<1x16x32xbf16>
    %28 = vector.shape_cast %27 : vector<1x16x32xbf16> to vector<16x32xbf16>
    %cst_22 = arith.constant dense<0.000000e+00> : vector<32x32xf32>
    %29 = tpu.matmul %26, %28, %cst_22 {dimension_numbers = #tpu.dot_dimension_numbers<[1], [0], [0], [1], [0, 0, 1, 1], [], []>} : vector<32x16xbf16>, vector<16x32xbf16>, vector<32x32xf32> -> vector<32x32xf32>
    %30 = vector.extract_strided_slice %9 {offsets = [160, 0], sizes = [32, 16], strides = [1, 1]} : vector<512x16xbf16> to vector<32x16xbf16>
    %c5 = arith.constant 5 : index
    %c0_23 = arith.constant 0 : index
    %c0_24 = arith.constant 0 : index
    %31 = vector.load %arg4[%c5, %c0_23, %c0_24] : memref<16x16x32xbf16, #tpu.memory_space<vmem>>, vector<1x16x32xbf16>
    %32 = vector.shape_cast %31 : vector<1x16x32xbf16> to vector<16x32xbf16>
    %cst_25 = arith.constant dense<0.000000e+00> : vector<32x32xf32>
    %33 = tpu.matmul %30, %32, %cst_25 {dimension_numbers = #tpu.dot_dimension_numbers<[1], [0], [0], [1], [0, 0, 1, 1], [], []>} : vector<32x16xbf16>, vector<16x32xbf16>, vector<32x32xf32> -> vector<32x32xf32>
    %34 = vector.extract_strided_slice %9 {offsets = [192, 0], sizes = [32, 16], strides = [1, 1]} : vector<512x16xbf16> to vector<32x16xbf16>
    %c6 = arith.constant 6 : index
    %c0_26 = arith.constant 0 : index
    %c0_27 = arith.constant 0 : index
    %35 = vector.load %arg4[%c6, %c0_26, %c0_27] : memref<16x16x32xbf16, #tpu.memory_space<vmem>>, vector<1x16x32xbf16>
    %36 = vector.shape_cast %35 : vector<1x16x32xbf16> to vector<16x32xbf16>
    %cst_28 = arith.constant dense<0.000000e+00> : vector<32x32xf32>
    %37 = tpu.matmul %34, %36, %cst_28 {dimension_numbers = #tpu.dot_dimension_numbers<[1], [0], [0], [1], [0, 0, 1, 1], [], []>} : vector<32x16xbf16>, vector<16x32xbf16>, vector<32x32xf32> -> vector<32x32xf32>
    %38 = vector.extract_strided_slice %9 {offsets = [224, 0], sizes = [32, 16], strides = [1, 1]} : vector<512x16xbf16> to vector<32x16xbf16>
    %c7 = arith.constant 7 : index
    %c0_29 = arith.constant 0 : index
    %c0_30 = arith.constant 0 : index
    %39 = vector.load %arg4[%c7, %c0_29, %c0_30] : memref<16x16x32xbf16, #tpu.memory_space<vmem>>, vector<1x16x32xbf16>
    %40 = vector.shape_cast %39 : vector<1x16x32xbf16> to vector<16x32xbf16>
    %cst_31 = arith.constant dense<0.000000e+00> : vector<32x32xf32>
    %41 = tpu.matmul %38, %40, %cst_31 {dimension_numbers = #tpu.dot_dimension_numbers<[1], [0], [0], [1], [0, 0, 1, 1], [], []>} : vector<32x16xbf16>, vector<16x32xbf16>, vector<32x32xf32> -> vector<32x32xf32>
    %42 = vector.extract_strided_slice %9 {offsets = [256, 0], sizes = [32, 16], strides = [1, 1]} : vector<512x16xbf16> to vector<32x16xbf16>
    %c8 = arith.constant 8 : index
    %c0_32 = arith.constant 0 : index
    %c0_33 = arith.constant 0 : index
    %43 = vector.load %arg4[%c8, %c0_32, %c0_33] : memref<16x16x32xbf16, #tpu.memory_space<vmem>>, vector<1x16x32xbf16>
    %44 = vector.shape_cast %43 : vector<1x16x32xbf16> to vector<16x32xbf16>
    %cst_34 = arith.constant dense<0.000000e+00> : vector<32x32xf32>
    %45 = tpu.matmul %42, %44, %cst_34 {dimension_numbers = #tpu.dot_dimension_numbers<[1], [0], [0], [1], [0, 0, 1, 1], [], []>} : vector<32x16xbf16>, vector<16x32xbf16>, vector<32x32xf32> -> vector<32x32xf32>
    %46 = vector.extract_strided_slice %9 {offsets = [288, 0], sizes = [32, 16], strides = [1, 1]} : vector<512x16xbf16> to vector<32x16xbf16>
    %c9 = arith.constant 9 : index
    %c0_35 = arith.constant 0 : index
    %c0_36 = arith.constant 0 : index
    %47 = vector.load %arg4[%c9, %c0_35, %c0_36] : memref<16x16x32xbf16, #tpu.memory_space<vmem>>, vector<1x16x32xbf16>
    %48 = vector.shape_cast %47 : vector<1x16x32xbf16> to vector<16x32xbf16>
    %cst_37 = arith.constant dense<0.000000e+00> : vector<32x32xf32>
    %49 = tpu.matmul %46, %48, %cst_37 {dimension_numbers = #tpu.dot_dimension_numbers<[1], [0], [0], [1], [0, 0, 1, 1], [], []>} : vector<32x16xbf16>, vector<16x32xbf16>, vector<32x32xf32> -> vector<32x32xf32>
    %50 = vector.extract_strided_slice %9 {offsets = [320, 0], sizes = [32, 16], strides = [1, 1]} : vector<512x16xbf16> to vector<32x16xbf16>
    %c10 = arith.constant 10 : index
    %c0_38 = arith.constant 0 : index
    %c0_39 = arith.constant 0 : index
    %51 = vector.load %arg4[%c10, %c0_38, %c0_39] : memref<16x16x32xbf16, #tpu.memory_space<vmem>>, vector<1x16x32xbf16>
    %52 = vector.shape_cast %51 : vector<1x16x32xbf16> to vector<16x32xbf16>
    %cst_40 = arith.constant dense<0.000000e+00> : vector<32x32xf32>
    %53 = tpu.matmul %50, %52, %cst_40 {dimension_numbers = #tpu.dot_dimension_numbers<[1], [0], [0], [1], [0, 0, 1, 1], [], []>} : vector<32x16xbf16>, vector<16x32xbf16>, vector<32x32xf32> -> vector<32x32xf32>
    %54 = vector.extract_strided_slice %9 {offsets = [352, 0], sizes = [32, 16], strides = [1, 1]} : vector<512x16xbf16> to vector<32x16xbf16>
    %c11 = arith.constant 11 : index
    %c0_41 = arith.constant 0 : index
    %c0_42 = arith.constant 0 : index
    %55 = vector.load %arg4[%c11, %c0_41, %c0_42] : memref<16x16x32xbf16, #tpu.memory_space<vmem>>, vector<1x16x32xbf16>
    %56 = vector.shape_cast %55 : vector<1x16x32xbf16> to vector<16x32xbf16>
    %cst_43 = arith.constant dense<0.000000e+00> : vector<32x32xf32>
    %57 = tpu.matmul %54, %56, %cst_43 {dimension_numbers = #tpu.dot_dimension_numbers<[1], [0], [0], [1], [0, 0, 1, 1], [], []>} : vector<32x16xbf16>, vector<16x32xbf16>, vector<32x32xf32> -> vector<32x32xf32>
    %58 = vector.extract_strided_slice %9 {offsets = [384, 0], sizes = [32, 16], strides = [1, 1]} : vector<512x16xbf16> to vector<32x16xbf16>
    %c12 = arith.constant 12 : index
    %c0_44 = arith.constant 0 : index
    %c0_45 = arith.constant 0 : index
    %59 = vector.load %arg4[%c12, %c0_44, %c0_45] : memref<16x16x32xbf16, #tpu.memory_space<vmem>>, vector<1x16x32xbf16>
    %60 = vector.shape_cast %59 : vector<1x16x32xbf16> to vector<16x32xbf16>
    %cst_46 = arith.constant dense<0.000000e+00> : vector<32x32xf32>
    %61 = tpu.matmul %58, %60, %cst_46 {dimension_numbers = #tpu.dot_dimension_numbers<[1], [0], [0], [1], [0, 0, 1, 1], [], []>} : vector<32x16xbf16>, vector<16x32xbf16>, vector<32x32xf32> -> vector<32x32xf32>
    %62 = vector.extract_strided_slice %9 {offsets = [416, 0], sizes = [32, 16], strides = [1, 1]} : vector<512x16xbf16> to vector<32x16xbf16>
    %c13 = arith.constant 13 : index
    %c0_47 = arith.constant 0 : index
    %c0_48 = arith.constant 0 : index
    %63 = vector.load %arg4[%c13, %c0_47, %c0_48] : memref<16x16x32xbf16, #tpu.memory_space<vmem>>, vector<1x16x32xbf16>
    %64 = vector.shape_cast %63 : vector<1x16x32xbf16> to vector<16x32xbf16>
    %cst_49 = arith.constant dense<0.000000e+00> : vector<32x32xf32>
    %65 = tpu.matmul %62, %64, %cst_49 {dimension_numbers = #tpu.dot_dimension_numbers<[1], [0], [0], [1], [0, 0, 1, 1], [], []>} : vector<32x16xbf16>, vector<16x32xbf16>, vector<32x32xf32> -> vector<32x32xf32>
    %66 = vector.extract_strided_slice %9 {offsets = [448, 0], sizes = [32, 16], strides = [1, 1]} : vector<512x16xbf16> to vector<32x16xbf16>
    %c14 = arith.constant 14 : index
    %c0_50 = arith.constant 0 : index
    %c0_51 = arith.constant 0 : index
    %67 = vector.load %arg4[%c14, %c0_50, %c0_51] : memref<16x16x32xbf16, #tpu.memory_space<vmem>>, vector<1x16x32xbf16>
    %68 = vector.shape_cast %67 : vector<1x16x32xbf16> to vector<16x32xbf16>
    %cst_52 = arith.constant dense<0.000000e+00> : vector<32x32xf32>
    %69 = tpu.matmul %66, %68, %cst_52 {dimension_numbers = #tpu.dot_dimension_numbers<[1], [0], [0], [1], [0, 0, 1, 1], [], []>} : vector<32x16xbf16>, vector<16x32xbf16>, vector<32x32xf32> -> vector<32x32xf32>
    %70 = vector.extract_strided_slice %9 {offsets = [480, 0], sizes = [32, 16], strides = [1, 1]} : vector<512x16xbf16> to vector<32x16xbf16>
    %c15 = arith.constant 15 : index
    %c0_53 = arith.constant 0 : index
    %c0_54 = arith.constant 0 : index
    %71 = vector.load %arg4[%c15, %c0_53, %c0_54] : memref<16x16x32xbf16, #tpu.memory_space<vmem>>, vector<1x16x32xbf16>
    %72 = vector.shape_cast %71 : vector<1x16x32xbf16> to vector<16x32xbf16>
    %cst_55 = arith.constant dense<0.000000e+00> : vector<32x32xf32>
    %73 = tpu.matmul %70, %72, %cst_55 {dimension_numbers = #tpu.dot_dimension_numbers<[1], [0], [0], [1], [0, 0, 1, 1], [], []>} : vector<32x16xbf16>, vector<16x32xbf16>, vector<32x32xf32> -> vector<32x32xf32>
    %74 = arith.addf %13, %17 : vector<32x32xf32>
    %75 = arith.addf %21, %25 : vector<32x32xf32>
    %76 = arith.addf %29, %33 : vector<32x32xf32>
    %77 = arith.addf %37, %41 : vector<32x32xf32>
    %78 = arith.addf %45, %49 : vector<32x32xf32>
    %79 = arith.addf %53, %57 : vector<32x32xf32>
    %80 = arith.addf %61, %65 : vector<32x32xf32>
    %81 = arith.addf %69, %73 : vector<32x32xf32>
    %82 = arith.addf %74, %75 : vector<32x32xf32>
    %83 = arith.addf %76, %77 : vector<32x32xf32>
    %84 = arith.addf %78, %79 : vector<32x32xf32>
    %85 = arith.addf %80, %81 : vector<32x32xf32>
    %86 = arith.addf %82, %83 : vector<32x32xf32>
    %87 = arith.addf %84, %85 : vector<32x32xf32>
    %88 = arith.addf %86, %87 : vector<32x32xf32>
    %c0_56 = arith.constant 0 : index
    %c0_57 = arith.constant 0 : index
    %89 = vector.load %arg5[%c0_56, %c0_57] : memref<1x32xf32, #tpu.memory_space<vmem>>, vector<1x32xf32>
    %90 = vector.broadcast %89 : vector<1x32xf32> to vector<32x32xf32>
    %91 = arith.addf %88, %90 : vector<32x32xf32>
    %cst_58 = arith.constant 0.000000e+00 : f32
    %92 = vector.broadcast %cst_58 : f32 to vector<32x32xf32>
    %93 = arith.maximumf %91, %92 : vector<32x32xf32>
    %94 = arith.truncf %93 : vector<32x32xf32> to vector<32x32xbf16>
    %95 = vector.extract_strided_slice %94 {offsets = [0, 0], sizes = [8, 32], strides = [1, 1]} : vector<32x32xbf16> to vector<8x32xbf16>
    %c0_59 = arith.constant 0 : index
    %c0_60 = arith.constant 0 : index
    %c0_61 = arith.constant 0 : index
    %96 = vector.load %arg6[%c0_59, %c0_60, %c0_61] : memref<4x32x128xbf16, #tpu.memory_space<vmem>>, vector<1x32x128xbf16>
    %97 = vector.shape_cast %96 : vector<1x32x128xbf16> to vector<32x128xbf16>
    %cst_62 = arith.constant dense<0.000000e+00> : vector<8x128xf32>
    %98 = tpu.matmul %95, %97, %cst_62 {dimension_numbers = #tpu.dot_dimension_numbers<[1], [0], [0], [1], [0, 0, 1, 1], [], []>} : vector<8x32xbf16>, vector<32x128xbf16>, vector<8x128xf32> -> vector<8x128xf32>
    %99 = vector.extract_strided_slice %94 {offsets = [8, 0], sizes = [8, 32], strides = [1, 1]} : vector<32x32xbf16> to vector<8x32xbf16>
    %c1_63 = arith.constant 1 : index
    %c0_64 = arith.constant 0 : index
    %c0_65 = arith.constant 0 : index
    %100 = vector.load %arg6[%c1_63, %c0_64, %c0_65] : memref<4x32x128xbf16, #tpu.memory_space<vmem>>, vector<1x32x128xbf16>
    %101 = vector.shape_cast %100 : vector<1x32x128xbf16> to vector<32x128xbf16>
    %cst_66 = arith.constant dense<0.000000e+00> : vector<8x128xf32>
    %102 = tpu.matmul %99, %101, %cst_66 {dimension_numbers = #tpu.dot_dimension_numbers<[1], [0], [0], [1], [0, 0, 1, 1], [], []>} : vector<8x32xbf16>, vector<32x128xbf16>, vector<8x128xf32> -> vector<8x128xf32>
    %103 = vector.extract_strided_slice %94 {offsets = [16, 0], sizes = [8, 32], strides = [1, 1]} : vector<32x32xbf16> to vector<8x32xbf16>
    %c2_67 = arith.constant 2 : index
    %c0_68 = arith.constant 0 : index
    %c0_69 = arith.constant 0 : index
    %104 = vector.load %arg6[%c2_67, %c0_68, %c0_69] : memref<4x32x128xbf16, #tpu.memory_space<vmem>>, vector<1x32x128xbf16>
    %105 = vector.shape_cast %104 : vector<1x32x128xbf16> to vector<32x128xbf16>
    %cst_70 = arith.constant dense<0.000000e+00> : vector<8x128xf32>
    %106 = tpu.matmul %103, %105, %cst_70 {dimension_numbers = #tpu.dot_dimension_numbers<[1], [0], [0], [1], [0, 0, 1, 1], [], []>} : vector<8x32xbf16>, vector<32x128xbf16>, vector<8x128xf32> -> vector<8x128xf32>
    %107 = vector.extract_strided_slice %94 {offsets = [24, 0], sizes = [8, 32], strides = [1, 1]} : vector<32x32xbf16> to vector<8x32xbf16>
    %c3_71 = arith.constant 3 : index
    %c0_72 = arith.constant 0 : index
    %c0_73 = arith.constant 0 : index
    %108 = vector.load %arg6[%c3_71, %c0_72, %c0_73] : memref<4x32x128xbf16, #tpu.memory_space<vmem>>, vector<1x32x128xbf16>
    %109 = vector.shape_cast %108 : vector<1x32x128xbf16> to vector<32x128xbf16>
    %cst_74 = arith.constant dense<0.000000e+00> : vector<8x128xf32>
    %110 = tpu.matmul %107, %109, %cst_74 {dimension_numbers = #tpu.dot_dimension_numbers<[1], [0], [0], [1], [0, 0, 1, 1], [], []>} : vector<8x32xbf16>, vector<32x128xbf16>, vector<8x128xf32> -> vector<8x128xf32>
    %111 = arith.addf %98, %102 : vector<8x128xf32>
    %112 = arith.addf %106, %110 : vector<8x128xf32>
    %113 = arith.addf %111, %112 : vector<8x128xf32>
    %c0_75 = arith.constant 0 : index
    %c0_76 = arith.constant 0 : index
    %114 = vector.load %arg7[%c0_75, %c0_76] : memref<1x128xf32, #tpu.memory_space<vmem>>, vector<1x128xf32>
    %115 = vector.broadcast %114 : vector<1x128xf32> to vector<8x128xf32>
    %116 = arith.addf %113, %115 : vector<8x128xf32>
    %cst_77 = arith.constant 0.000000e+00 : f32
    %117 = vector.broadcast %cst_77 : f32 to vector<8x128xf32>
    %118 = arith.maximumf %116, %117 : vector<8x128xf32>
    %c0_78 = arith.constant 0 : index
    %c0_79 = arith.constant 0 : index
    %119 = vector.load %arg8[%c0_78, %c0_79] : memref<8x128xf32, #tpu.memory_space<vmem>>, vector<8x128xf32>
    tpu.vector_store %arg8[%c0_78, %c0_79], %118 {strides = array<i32>} : memref<8x128xf32, #tpu.memory_space<vmem>>, vector<8x128xf32>,
    return
  }
  func.func @transform_0(%arg0: i32) -> (i32, i32, i32) {
    %c0_i32 = arith.constant 0 : i32
    %c0_i32_0 = arith.constant 0 : i32
    %c0_i32_1 = arith.constant 0 : i32
    return %c0_i32, %arg0, %c0_i32_0 : i32, i32, i32
  }
  func.func @transform_1(%arg0: i32) -> (i32, i32) {
    %c0_i32 = arith.constant 0 : i32
    %c0_i32_0 = arith.constant 0 : i32
    %c0_i32_1 = arith.constant 0 : i32
    return %c0_i32, %c0_i32_0 : i32, i32
  }
  func.func @transform_2(%arg0: i32) -> (i32, i32) {
    %c0_i32 = arith.constant 0 : i32
    %c0_i32_0 = arith.constant 0 : i32
    %c0_i32_1 = arith.constant 0 : i32
    return %c0_i32, %c0_i32_0 : i32, i32
  }
  func.func @transform_3(%arg0: i32) -> (i32, i32, i32) {
    %c0_i32 = arith.constant 0 : i32
    %c0_i32_0 = arith.constant 0 : i32
    %c0_i32_1 = arith.constant 0 : i32
    %c0_i32_2 = arith.constant 0 : i32
    return %c0_i32, %c0_i32_0, %c0_i32_1 : i32, i32, i32
  }
  func.func @transform_4(%arg0: i32) -> (i32, i32) {
    %c0_i32 = arith.constant 0 : i32
    %c0_i32_0 = arith.constant 0 : i32
    %c0_i32_1 = arith.constant 0 : i32
    return %c0_i32, %c0_i32_0 : i32, i32
  }
  func.func @transform_5(%arg0: i32) -> (i32, i32, i32) {
    %c0_i32 = arith.constant 0 : i32
    %c0_i32_0 = arith.constant 0 : i32
    %c0_i32_1 = arith.constant 0 : i32
    %c0_i32_2 = arith.constant 0 : i32
    return %c0_i32, %c0_i32_0, %c0_i32_1 : i32, i32, i32
  }
  func.func @transform_6(%arg0: i32) -> (i32, i32) {
    %c0_i32 = arith.constant 0 : i32
    %c0_i32_0 = arith.constant 0 : i32
    %c0_i32_1 = arith.constant 0 : i32
    return %c0_i32, %c0_i32_0 : i32, i32
  }
  func.func @transform_7(%arg0: i32) -> (i32, i32) {
    %c0_i32 = arith.constant 0 : i32
    %c0_i32_0 = arith.constant 0 : i32
    return %arg0, %c0_i32 : i32, i32
  }
}

</mosaic_0001>

<bundles_post_ra>
// kernel: mini_cnn_forward.1
= control target key start
LH: loop header
LB: loop body
LE: loop exit
PB: predicated region body
PF: predicated region fallthrough
CT: control target
= control target key end

     0   :  { %vm290_vm0 = vcmask 523264   ;;  %vm783_vm1 = vcmask 130048   ;;  %vm2692_vm2 = vmmov 0   ;;  %vm1864_vm3 = vcmask 261120   ;;  %s3117_s1 = inlined_call_operand.vmem [shape: bf16[64,16], index: 1, kind: input, shape index: {}]   ;;  %s3118_s0 = inlined_call_operand.vmem [shape: bf16[64,8,64], index: 0, kind: input, shape index: {}]   ;;  %s3119_s3 = inlined_call_operand.vmem [shape: bf16[16,16,32], index: 3, kind: input, shape index: {}]   ;;  %s3120_s2 = inlined_call_operand.vmem [shape: f32[1,16], index: 2, kind: input, shape index: {}]   ;;  %s3121_s5 = inlined_call_operand.vmem [shape: bf16[4,32,128], index: 5, kind: input, shape index: {}]   ;;  %s3122_s4 = inlined_call_operand.vmem [shape: f32[1,32], index: 4, kind: input, shape index: {}]   ;;  %s3123_s6 = inlined_call_operand.vmem [shape: f32[1,128], index: 6, kind: input, shape index: {}]   ;;  %s3124_s7 = inlined_call_operand.vmem [shape: f32[8,128], index: 7, kind: output, shape index: {}]  }
   0x1   :  { %v2631_v0 = vld [vmem:[%s3117_s1] sm:$0xff]   ;;  %v2632_v1 = vld [vmem:[%s3117_s1 + $0x8] sm:$0xff]   ;;  %v2633_v2 = vld [vmem:[%s3117_s1 + $0x10] sm:$0xff]  }
   0x2   :  { %2369 = vmatprep.subr.bf16.mxu0 %v2631_v0  ;;  %v2635_v3 = vld [vmem:[%s3118_s0] sm:$0xff]   ;;  %v2634_v4 = vld [vmem:[%s3117_s1 + $0x18] sm:$0xff]   ;;  %v2636_v5 = vld [vmem:[%s3118_s0 + $0x8] sm:$0xff]  }
   0x3   :  { %2370 = vmatpush3.bf16.msra.mxu0 %v2631_v0  ;;  %2377 = vmatprep.mubr.msk.bf16.mxu0 %vm290_vm0, %v2635_v3  ;;  %v2637_v6 = vld [vmem:[%s3118_s0 + $0x10] sm:$0xff]   ;;  %v2638_v7 = vld [vmem:[%s3118_s0 + $0x18] sm:$0xff]   ;;  %v2639_v8 = vld [vmem:[%s3118_s0 + $0x20] sm:$0xff]  }
   0x4   :  { %2371 = vmatprep.subr.bf16.mxu0 %v2632_v1  ;;  %v2640_v9 = vld [vmem:[%s3118_s0 + $0x28] sm:$0xff]   ;;  %v2641_v10 = vld [vmem:[%s3118_s0 + $0x30] sm:$0xff]   ;;  %v2642_v11 = vld [vmem:[%s3118_s0 + $0x38] sm:$0xff]  }
   0x5   :  { %v2643_v12 = vld [vmem:[%s3118_s0 + $0x40] sm:$0xff]   ;;  %v2644_v13 = vld [vmem:[%s3118_s0 + $0x48] sm:$0xff]   ;;  %v2645_v14 = vld [vmem:[%s3118_s0 + $0x50] sm:$0xff]  }
   0x6   :  { %v2646_v15 = vld [vmem:[%s3118_s0 + $0x58] sm:$0xff]   ;;  %v2647_v16 = vld [vmem:[%s3118_s0 + $0x60] sm:$0xff]   ;;  %v2648_v17 = vld [vmem:[%s3118_s0 + $0x68] sm:$0xff]  }
   0x7   :  { %2372 = vmatpush3.bf16.msra.mxu0 %v2632_v1  ;;  %v2649_v18 = vld [vmem:[%s3118_s0 + $0x70] sm:$0xff]   ;;  %v2650_v19 = vld [vmem:[%s3118_s0 + $0x78] sm:$0xff]   ;;  %v2651_v20 = vld [vmem:[%s3118_s0 + $0x80] sm:$0xff]  }
   0x8   :  { %2373 = vmatprep.subr.bf16.mxu0 %v2633_v2  ;;  %v2652_v21 = vld [vmem:[%s3118_s0 + $0x88] sm:$0xff]   ;;  %v2653_v22 = vld [vmem:[%s3118_s0 + $0x90] sm:$0xff]   ;;  %v2654_v23 = vld [vmem:[%s3118_s0 + $0x98] sm:$0xff]  }
   0x9   :  { %v2655_v24 = vld [vmem:[%s3118_s0 + $0xa0] sm:$0xff]   ;;  %v2656_v25 = vld [vmem:[%s3118_s0 + $0xa8] sm:$0xff]   ;;  %v2657_v26 = vld [vmem:[%s3118_s0 + $0xb0] sm:$0xff]  }
   0xa   :  { %v2658_v27 = vld [vmem:[%s3118_s0 + $0xb8] sm:$0xff]   ;;  %v2659_v28 = vld [vmem:[%s3118_s0 + $0xc0] sm:$0xff]   ;;  %v2660_v29 = vld [vmem:[%s3118_s0 + $0xc8] sm:$0xff]  }
   0xb   :  { %2374 = vmatpush3.bf16.msra.mxu0 %v2633_v2  ;;  %v2661_v30 = vld [vmem:[%s3118_s0 + $0xd0] sm:$0xff]   ;;  %v2667_v31 = vld [vmem:[%s3119_s3 + $0x8] sm:$0xff]   ;;  %v2662_v32 = vld [vmem:[%s3118_s0 + $0xd8] sm:$0xff]  }
   0xc   :  { %2375 = vmatprep.subr.bf16.mxu0 %v2634_v4  ;;  %2441 = vmatprep.subr.bf16.mxu1 %v2667_v31  ;;  %v2663_v33 = vld [vmem:[%s3118_s0 + $0xe0] sm:$0xff]   ;;  %v2664_v34 = vld [vmem:[%s3118_s0 + $0xe8] sm:$0xff]   ;;  %v2665_v35 = vld [vmem:[%s3118_s0 + $0xf0] sm:$0xff]  }
   0xd   :  { %2442 = vmatpush3.bf16.msra.mxu1 %v2667_v31  ;;  %v2668_v36 = vld [vmem:[%s3119_s3 + $0x18] sm:$0xff]   ;;  %v2882_v38 = vld [vmem:[%s3120_s2] ss:$0 sm:$0xff] }
   0xe   :  { %2447 = vmatprep.subr.bf16.mxu1 %v2668_v36  ;;  %v2666_v37 = vld [vmem:[%s3118_s0 + $0xf8] sm:$0xff]  }
   0xf   :  { %2376 = vmatpush3.bf16.msra.mxu0 %v2634_v4 }
  0x12   :  { %2378 = vmatmul.mubr.msk.bf16.vlgmr.msra.gmra.mrb[0].mxu0 %vm290_vm0, %v2636_v5 }
  0x13   :  { %2381 = vmatprep.mubr.msk.bf16.mxu0 %vm290_vm0, %v2637_v6  ;;  %v2669_v6 = vld [vmem:[%s3119_s3 + $0x28] sm:$0xff]  }
  0x1a   :  { %2382 = vmatmul.mubr.msk.bf16.gmra.mrb[4].mxu0 %vm290_vm0, %v2638_v7 }
  0x1b   :  { %2385 = vmatprep.mubr.msk.bf16.mxu0 %vm290_vm0, %v2639_v8 }
  0x22   :  { %2386 = vmatmul.mubr.msk.bf16.gmra.mrb[8].mxu0 %vm290_vm0, %v2640_v9 }
  0x23   :  { %2389 = vmatprep.mubr.msk.bf16.mxu0 %vm290_vm0, %v2641_v10 }
  0x2a   :  { %2390 = vmatmul.mubr.msk.bf16.gmra.mrb[12].mxu0 %vm290_vm0, %v2642_v11 }
  0x2b   :  { %2393 = vmatprep.mubr.msk.bf16.mxu0 %vm290_vm0, %v2643_v12 }
  0x32   :  { %2394 = vmatmul.mubr.msk.bf16.gmra.mrb[16].mxu0 %vm290_vm0, %v2644_v13 }
  0x33   :  { %2397 = vmatprep.mubr.msk.bf16.mxu0 %vm290_vm0, %v2645_v14 }
  0x3a   :  { %2398 = vmatmul.mubr.msk.bf16.gmra.mrb[20].mxu0 %vm290_vm0, %v2646_v15 }
  0x3b   :  { %2401 = vmatprep.mubr.msk.bf16.mxu0 %vm290_vm0, %v2647_v16 }
  0x42   :  { %2402 = vmatmul.mubr.msk.bf16.gmra.mrb[24].mxu0 %vm290_vm0, %v2648_v17 }
  0x43   :  { %2405 = vmatprep.mubr.msk.bf16.mxu0 %vm290_vm0, %v2649_v18 }
  0x4a   :  { %2406 = vmatmul.mubr.msk.bf16.gmra.mrb[28].mxu0 %vm290_vm0, %v2650_v19 }
  0x4b   :  { %2409 = vmatprep.mubr.msk.bf16.mxu0 %vm290_vm0, %v2651_v20 }
  0x52   :  { %2410 = vmatmul.mubr.msk.bf16.gmra.mrb[32].mxu0 %vm290_vm0, %v2652_v21 }
  0x53   :  { %2413 = vmatprep.mubr.msk.bf16.mxu0 %vm290_vm0, %v2653_v22 }
  0x5a   :  { %2414 = vmatmul.mubr.msk.bf16.gmra.mrb[36].mxu0 %vm290_vm0, %v2654_v23 }
  0x5b   :  { %2417 = vmatprep.mubr.msk.bf16.mxu0 %vm290_vm0, %v2655_v24 }
  0x62   :  { %2418 = vmatmul.mubr.msk.bf16.gmra.mrb[40].mxu0 %vm290_vm0, %v2656_v25 }
  0x63   :  { %2421 = vmatprep.mubr.msk.bf16.mxu0 %vm290_vm0, %v2657_v26 }
  0x6a   :  { %2422 = vmatmul.mubr.msk.bf16.gmra.mrb[44].mxu0 %vm290_vm0, %v2658_v27 }
  0x6b   :  { %2425 = vmatprep.mubr.msk.bf16.mxu0 %vm290_vm0, %v2659_v28 }
  0x72   :  { %2426 = vmatmul.mubr.msk.bf16.gmra.mrb[48].mxu0 %vm290_vm0, %v2660_v29 }
  0x73   :  { %2429 = vmatprep.mubr.msk.bf16.mxu0 %vm290_vm0, %v2661_v30 }
  0x7a   :  { %2430 = vmatmul.mubr.msk.bf16.gmra.mrb[52].mxu0 %vm290_vm0, %v2662_v32 }
  0x7b   :  { %2433 = vmatprep.mubr.msk.bf16.mxu0 %vm290_vm0, %v2663_v33 }
  0x82   :  { %2434 = vmatmul.mubr.msk.bf16.gmra.mrb[56].mxu0 %vm290_vm0, %v2664_v34 }
  0x83   :  { %2437 = vmatprep.mubr.msk.bf16.mxu0 %vm290_vm0, %v2665_v35  ;;  %v2670_v35 = vld [vmem:[%s3119_s3 + $0x38] sm:$0xff]  }
  0x8a   :  { %2438 = vmatmul.mubr.msk.bf16.gmra.mrb[60].mxu0 %vm290_vm0, %v2666_v37 }
  0xe5   :  { %v2379_v39 = vpop.f32.mrb[0].mxu0 }
  0xe6   :  { %v430_v40 = vadd.f32 %v2379_v39, %v2882_v38  ;;  %v421_v41 = vpop.f32.mrb[1].mxu0 }
  0xe7   :  { %v422_v42 = vadd.f32 %v2882_v38, %v421_v41  ;;  %v2380_v43 = vpop.f32.mrb[2].mxu0 }
  0xe8   :  { %v433_v44 = vadd.f32 %v2380_v43, %v2882_v38  ;;  %v424_v45 = vpop.f32.mrb[3].mxu0  ;;  %v678_v47 = vmax.f32 %v430_v40, 0.0 }
  0xe9   :  { %v425_v46 = vadd.f32 %v2882_v38, %v424_v45  ;;  %v676_v49 = vmax.f32 %v422_v42, 0.0 }
  0xea   :  { %v679_v48 = vmax.f32 %v433_v44, 0.0 }
  0xeb   :  { %v677_v50 = vmax.f32 %v425_v46, 0.0 }
  0xec   :  { %v2888_v51 = vpack.c.bf16 %v679_v48, %v678_v47 }
  0xed   :  { %v2890_v52 = vpack.c.bf16 %v677_v50, %v676_v49  ;;  %v2383_v53 = vpop.f32.mrb[4].mxu0 }
  0xee   :  { %v446_v54 = vadd.f32 %v2383_v53, %v2882_v38  ;;  %v437_v55 = vpop.f32.mrb[5].mxu0 }
  0xef   :  { %v438_v56 = vadd.f32 %v2882_v38, %v437_v55  ;;  %v2384_v57 = vpop.f32.mrb[6].mxu0 }
  0xf0   :  { %v449_v58 = vadd.f32 %v2384_v57, %v2882_v38  ;;  %v440_v59 = vpop.f32.mrb[7].mxu0  ;;  %v682_v61 = vmax.f32 %v446_v54, 0.0 }
  0xf1   :  { %v441_v60 = vadd.f32 %v2882_v38, %v440_v59  ;;  %v680_v63 = vmax.f32 %v438_v56, 0.0 }
  0xf2   :  { %v683_v62 = vmax.f32 %v449_v58, 0.0 }
  0xf3   :  { %v681_v0 = vmax.f32 %v441_v60, 0.0 }
  0xf4   :  { %v743_v1 = vpack.c.bf16 %v683_v62, %v682_v61 }
  0xf5   :  { %v2387_v2 = vpop.f32.mrb[8].mxu0  ;;  %v742_v3 = vpack.c.bf16 %v681_v0, %v680_v63 }
  0xf6   :  { %v462_v4 = vadd.f32 %v2387_v2, %v2882_v38  ;;  %v453_v5 = vpop.f32.mrb[9].mxu0 }
  0xf7   :  { %v454_v7 = vadd.f32 %v2882_v38, %v453_v5  ;;  %v2388_v8 = vpop.f32.mrb[10].mxu0  ;;  %2443 = vmatprep.mubr.msk.bf16.mxu1 %vm783_vm1, %v742_v3  ;;  %v2671_v3 = vld [vmem:[%s3119_s3 + $0x48] sm:$0xff]  }
  0xf8   :  { %v465_v9 = vadd.f32 %v2388_v8, %v2882_v38  ;;  %v456_v10 = vpop.f32.mrb[11].mxu0  ;;  %2444 = vmatmul.mubr.msk.bf16.vlgmr.msra.gmra.mrb[0].mxu1 %vm783_vm1, %v743_v1  ;;  %v686_v12 = vmax.f32 %v462_v4, 0.0 }
  0xf9   :  { %v457_v11 = vadd.f32 %v2882_v38, %v456_v10  ;;  %2448 = vmatpush3.bf16.msra.mxu1 %v2668_v36  ;;  %v684_v14 = vmax.f32 %v454_v7, 0.0 }
  0xfa   :  { %v687_v13 = vmax.f32 %v465_v9, 0.0  ;;  %2453 = vmatprep.subr.bf16.mxu1 %v2669_v6 }
  0xfb   :  { %v685_v15 = vmax.f32 %v457_v11, 0.0 }
  0xfc   :  { %v2905_v16 = vpack.c.bf16 %v687_v13, %v686_v12 }
  0xfd   :  { %v2907_v17 = vpack.c.bf16 %v685_v15, %v684_v14  ;;  %v2391_v18 = vpop.f32.mrb[12].mxu0 }
  0xfe   :  { %v478_v19 = vadd.f32 %v2391_v18, %v2882_v38  ;;  %v469_v20 = vpop.f32.mrb[13].mxu0 }
  0xff   :  { %v470_v21 = vadd.f32 %v2882_v38, %v469_v20  ;;  %v2392_v22 = vpop.f32.mrb[14].mxu0 }
 0x100   :  { %v481_v23 = vadd.f32 %v2392_v22, %v2882_v38  ;;  %v472_v24 = vpop.f32.mrb[15].mxu0  ;;  %v690_v26 = vmax.f32 %v478_v19, 0.0 }
 0x101   :  { %v473_v25 = vadd.f32 %v2882_v38, %v472_v24  ;;  %v688_v28 = vmax.f32 %v470_v21, 0.0 }
 0x102   :  { %v691_v27 = vmax.f32 %v481_v23, 0.0 }
 0x103   :  { %v689_v29 = vmax.f32 %v473_v25, 0.0 }
 0x104   :  { %v747_v30 = vpack.c.bf16 %v691_v27, %v690_v26 }
 0x105   :  { %v746_v31 = vpack.c.bf16 %v689_v29, %v688_v28  ;;  %v2395_v32 = vpop.f32.mrb[16].mxu0 }
 0x106   :  { %v494_v33 = vadd.f32 %v2395_v32, %v2882_v38  ;;  %v485_v34 = vpop.f32.mrb[17].mxu0 }
 0x107   :  { %v486_v36 = vadd.f32 %v2882_v38, %v485_v34  ;;  %v2396_v37 = vpop.f32.mrb[18].mxu0  ;;  %2449 = vmatprep.mubr.msk.bf16.mxu1 %vm783_vm1, %v746_v31  ;;  %v2672_v34 = vld [vmem:[%s3119_s3 + $0x58] sm:$0xff]  }
 0x108   :  { %v497_v39 = vadd.f32 %v2396_v37, %v2882_v38  ;;  %v488_v40 = vpop.f32.mrb[19].mxu0  ;;  %2450 = vmatmul.mubr.msk.bf16.vlgmr.msra.gmra.mrb[0].mxu1 %vm783_vm1, %v747_v30  ;;  %v694_v42 = vmax.f32 %v494_v33, 0.0 }
 0x109   :  { %v489_v41 = vadd.f32 %v2882_v38, %v488_v40  ;;  %2454 = vmatpush3.bf16.msra.mxu1 %v2669_v6  ;;  %v692_v44 = vmax.f32 %v486_v36, 0.0 }
 0x10a   :  { %v695_v43 = vmax.f32 %v497_v39, 0.0  ;;  %2459 = vmatprep.subr.bf16.mxu1 %v2670_v35 }
 0x10b   :  { %v693_v45 = vmax.f32 %v489_v41, 0.0 }
 0x10c   :  { %v2922_v46 = vpack.c.bf16 %v695_v43, %v694_v42 }
 0x10d   :  { %v2924_v47 = vpack.c.bf16 %v693_v45, %v692_v44  ;;  %v2399_v48 = vpop.f32.mrb[20].mxu0 }
 0x10e   :  { %v510_v49 = vadd.f32 %v2399_v48, %v2882_v38  ;;  %v501_v50 = vpop.f32.mrb[21].mxu0 }
 0x10f   :  { %v502_v53 = vadd.f32 %v2882_v38, %v501_v50  ;;  %v2400_v54 = vpop.f32.mrb[22].mxu0 }
 0x110   :  { %v513_v55 = vadd.f32 %v2400_v54, %v2882_v38  ;;  %v504_v56 = vpop.f32.mrb[23].mxu0  ;;  %v698_v58 = vmax.f32 %v510_v49, 0.0 }
 0x111   :  { %v505_v57 = vadd.f32 %v2882_v38, %v504_v56  ;;  %v696_v60 = vmax.f32 %v502_v53, 0.0 }
 0x112   :  { %v699_v59 = vmax.f32 %v513_v55, 0.0 }
 0x113   :  { %v697_v61 = vmax.f32 %v505_v57, 0.0 }
 0x114   :  { %v751_v62 = vpack.c.bf16 %v699_v59, %v698_v58 }
 0x115   :  { %v750_v63 = vpack.c.bf16 %v697_v61, %v696_v60  ;;  %v2403_v0 = vpop.f32.mrb[24].mxu0 }
 0x116   :  { %v526_v1 = vadd.f32 %v2403_v0, %v2882_v38  ;;  %v517_v2 = vpop.f32.mrb[25].mxu0 }
 0x117   :  { %v518_v4 = vadd.f32 %v2882_v38, %v517_v2  ;;  %v2404_v5 = vpop.f32.mrb[26].mxu0  ;;  %2455 = vmatprep.mubr.msk.bf16.mxu1 %vm783_vm1, %v750_v63 }
 0x118   :  { %v529_v6 = vadd.f32 %v2404_v5, %v2882_v38  ;;  %v520_v7 = vpop.f32.mrb[27].mxu0  ;;  %2456 = vmatmul.mubr.msk.bf16.vlgmr.msra.gmra.mrb[0].mxu1 %vm783_vm1, %v751_v62  ;;  %v702_v9 = vmax.f32 %v526_v1, 0.0 }
 0x119   :  { %v521_v8 = vadd.f32 %v2882_v38, %v520_v7  ;;  %2460 = vmatpush3.bf16.msra.mxu1 %v2670_v35  ;;  %v700_v11 = vmax.f32 %v518_v4, 0.0  ;;  %v2673_v4 = vld [vmem:[%s3119_s3 + $0x68] sm:$0xff]  }
 0x11a   :  { %v703_v10 = vmax.f32 %v529_v6, 0.0  ;;  %2465 = vmatprep.subr.bf16.mxu1 %v2671_v3 }
 0x11b   :  { %v701_v12 = vmax.f32 %v521_v8, 0.0 }
 0x11c   :  { %v2939_v13 = vpack.c.bf16 %v703_v10, %v702_v9 }
 0x11d   :  { %v2941_v14 = vpack.c.bf16 %v701_v12, %v700_v11  ;;  %v2407_v15 = vpop.f32.mrb[28].mxu0 }
 0x11e   :  { %v542_v18 = vadd.f32 %v2407_v15, %v2882_v38  ;;  %v533_v19 = vpop.f32.mrb[29].mxu0 }
 0x11f   :  { %v534_v20 = vadd.f32 %v2882_v38, %v533_v19  ;;  %v2408_v21 = vpop.f32.mrb[30].mxu0 }
 0x120   :  { %v545_v22 = vadd.f32 %v2408_v21, %v2882_v38  ;;  %v536_v23 = vpop.f32.mrb[31].mxu0  ;;  %v706_v25 = vmax.f32 %v542_v18, 0.0 }
 0x121   :  { %v537_v24 = vadd.f32 %v2882_v38, %v536_v23  ;;  %v704_v27 = vmax.f32 %v534_v20, 0.0 }
 0x122   :  { %v707_v26 = vmax.f32 %v545_v22, 0.0 }
 0x123   :  { %v705_v28 = vmax.f32 %v537_v24, 0.0 }
 0x124   :  { %v755_v29 = vpack.c.bf16 %v707_v26, %v706_v25 }
 0x125   :  { %v754_v30 = vpack.c.bf16 %v705_v28, %v704_v27  ;;  %v2411_v31 = vpop.f32.mrb[32].mxu0 }
 0x126   :  { %v558_v32 = vadd.f32 %v2411_v31, %v2882_v38  ;;  %v549_v33 = vpop.f32.mrb[33].mxu0 }
 0x127   :  { %v550_v35 = vadd.f32 %v2882_v38, %v549_v33  ;;  %v2412_v36 = vpop.f32.mrb[34].mxu0  ;;  %2461 = vmatprep.mubr.msk.bf16.mxu1 %vm783_vm1, %v754_v30 }
 0x128   :  { %v561_v37 = vadd.f32 %v2412_v36, %v2882_v38  ;;  %v552_v39 = vpop.f32.mrb[35].mxu0  ;;  %2462 = vmatmul.mubr.msk.bf16.vlgmr.msra.gmra.mrb[0].mxu1 %vm783_vm1, %v755_v29  ;;  %v710_v41 = vmax.f32 %v558_v32, 0.0 }
 0x129   :  { %v553_v40 = vadd.f32 %v2882_v38, %v552_v39  ;;  %2466 = vmatpush3.bf16.msra.mxu1 %v2671_v3  ;;  %v708_v43 = vmax.f32 %v550_v35, 0.0 }
 0x12a   :  { %v711_v42 = vmax.f32 %v561_v37, 0.0  ;;  %2471 = vmatprep.subr.bf16.mxu1 %v2672_v34  ;;  %v2674_v37 = vld [vmem:[%s3119_s3 + $0x78] sm:$0xff]  }
 0x12b   :  { %v709_v44 = vmax.f32 %v553_v40, 0.0 }
 0x12c   :  { %v2956_v45 = vpack.c.bf16 %v711_v42, %v710_v41 }
 0x12d   :  { %v2958_v48 = vpack.c.bf16 %v709_v44, %v708_v43  ;;  %v2415_v49 = vpop.f32.mrb[36].mxu0 }
 0x12e   :  { %v574_v50 = vadd.f32 %v2415_v49, %v2882_v38  ;;  %v565_v53 = vpop.f32.mrb[37].mxu0  ;;  %v2691_v49 = vmov 0.0  }
 0x12f   :  { %v566_v54 = vadd.f32 %v2882_v38, %v565_v53  ;;  %v2416_v55 = vpop.f32.mrb[38].mxu0  ;;  %2553 = vmatprep.subr.bf16.mxu0 %v2691_v49  ;;  %2557 = vmatprep.mubr.msk.bf16.mxu0 %vm2692_vm2, %v2691_v49 }
 0x130   :  { %v577_v56 = vadd.f32 %v2416_v55, %v2882_v38  ;;  %v568_v57 = vpop.f32.mrb[39].mxu0  ;;  %v714_v59 = vmax.f32 %v574_v50, 0.0  ;;  %v2683_v50 = vld [vmem:[%s3121_s5] sm:$0xff]  }
 0x131   :  { %v569_v58 = vadd.f32 %v2882_v38, %v568_v57  ;;  %v712_v61 = vmax.f32 %v566_v54, 0.0  ;;  %2554 = vmatpush3.bf16.msra.mxu0 %v2683_v50  ;;  %v2676_v50 = vld [vmem:[%s3119_s3 + $0x10] sm:$0xff]  }
 0x132   :  { %v715_v60 = vmax.f32 %v577_v56, 0.0  ;;  %v2684_v56 = vld [vmem:[%s3121_s5 + $0x8] sm:$0xff]   ;;  %2555 = vmatprep.subr.bf16.mxu0 %v2691_v49 }
 0x133   :  { %v713_v62 = vmax.f32 %v569_v58, 0.0 }
 0x134   :  { %v759_v63 = vpack.c.bf16 %v715_v60, %v714_v59 }
 0x135   :  { %v758_v0 = vpack.c.bf16 %v713_v62, %v712_v61  ;;  %v2419_v1 = vpop.f32.mrb[40].mxu0  ;;  %2556 = vmatpush3.bf16.msra.mxu0 %v2684_v56 }
 0x136   :  { %v590_v2 = vadd.f32 %v2419_v1, %v2882_v38  ;;  %v581_v3 = vpop.f32.mrb[41].mxu0 }
 0x137   :  { %v582_v5 = vadd.f32 %v2882_v38, %v581_v3  ;;  %v2420_v6 = vpop.f32.mrb[42].mxu0  ;;  %2467 = vmatprep.mubr.msk.bf16.mxu1 %vm783_vm1, %v758_v0 }
 0x138   :  { %v593_v7 = vadd.f32 %v2420_v6, %v2882_v38  ;;  %v584_v8 = vpop.f32.mrb[43].mxu0  ;;  %2468 = vmatmul.mubr.msk.bf16.vlgmr.msra.gmra.mrb[0].mxu1 %vm783_vm1, %v759_v63  ;;  %v718_v10 = vmax.f32 %v590_v2, 0.0 }
 0x139   :  { %v585_v9 = vadd.f32 %v2882_v38, %v584_v8  ;;  %2472 = vmatpush3.bf16.msra.mxu1 %v2672_v34  ;;  %v716_v12 = vmax.f32 %v582_v5, 0.0 }
 0x13a   :  { %v719_v11 = vmax.f32 %v593_v7, 0.0  ;;  %2477 = vmatprep.subr.bf16.mxu1 %v2673_v4 }
 0x13b   :  { %v717_v15 = vmax.f32 %v585_v9, 0.0 }
 0x13c   :  { %v2973_v18 = vpack.c.bf16 %v719_v11, %v718_v10 }
 0x13d   :  { %v2975_v19 = vpack.c.bf16 %v717_v15, %v716_v12  ;;  %v2423_v20 = vpop.f32.mrb[44].mxu0  ;;  %v2675_v12 = vld [vmem:[%s3119_s3] sm:$0xff]  }
 0x13e   :  { %v606_v21 = vadd.f32 %v2423_v20, %v2882_v38  ;;  %v597_v22 = vpop.f32.mrb[45].mxu0 }
 0x13f   :  { %v598_v23 = vadd.f32 %v2882_v38, %v597_v22  ;;  %v2424_v24 = vpop.f32.mrb[46].mxu0 }
 0x140   :  { %v609_v25 = vadd.f32 %v2424_v24, %v2882_v38  ;;  %v600_v26 = vpop.f32.mrb[47].mxu0  ;;  %v722_v28 = vmax.f32 %v606_v21, 0.0 }
 0x141   :  { %v601_v27 = vadd.f32 %v2882_v38, %v600_v26  ;;  %v720_v30 = vmax.f32 %v598_v23, 0.0 }
 0x142   :  { %v723_v29 = vmax.f32 %v609_v25, 0.0 }
 0x143   :  { %v721_v31 = vmax.f32 %v601_v27, 0.0 }
 0x144   :  { %v763_v32 = vpack.c.bf16 %v723_v29, %v722_v28 }
 0x145   :  { %v762_v33 = vpack.c.bf16 %v721_v31, %v720_v30  ;;  %v2427_v34 = vpop.f32.mrb[48].mxu0 }
 0x146   :  { %v622_v35 = vadd.f32 %v2427_v34, %v2882_v38  ;;  %v613_v36 = vpop.f32.mrb[49].mxu0 }
 0x147   :  { %v614_v39 = vadd.f32 %v2882_v38, %v613_v36  ;;  %v2428_v40 = vpop.f32.mrb[50].mxu0  ;;  %2473 = vmatprep.mubr.msk.bf16.mxu1 %vm783_vm1, %v762_v33 }
 0x148   :  { %v625_v41 = vadd.f32 %v2428_v40, %v2882_v38  ;;  %v616_v42 = vpop.f32.mrb[51].mxu0  ;;  %2474 = vmatmul.mubr.msk.bf16.vlgmr.msra.gmra.mrb[0].mxu1 %vm783_vm1, %v763_v32  ;;  %v726_v43 = vmax.f32 %v622_v35, 0.0 }
 0x149   :  { %v617_v44 = vadd.f32 %v2882_v38, %v616_v42  ;;  %2478 = vmatpush3.bf16.msra.mxu1 %v2673_v4  ;;  %v724_v53 = vmax.f32 %v614_v39, 0.0 }
 0x14a   :  { %v727_v54 = vmax.f32 %v625_v41, 0.0  ;;  %2483 = vmatprep.subr.bf16.mxu1 %v2674_v37 }
 0x14b   :  { %v725_v55 = vmax.f32 %v617_v44, 0.0 }
 0x14c   :  { %v2997_v57 = vpack.c.bf16 %v727_v54, %v726_v43 }
 0x14d   :  { %v3000_v58 = vpack.c.bf16 %v725_v55, %v724_v53  ;;  %v2431_v59 = vpop.f32.mrb[52].mxu0  ;;  %v2678_v53 = vld [vmem:[%s3119_s3 + $0x30] sm:$0xff]  }
 0x14e   :  { %v638_v60 = vadd.f32 %v2431_v59, %v2882_v38  ;;  %v629_v61 = vpop.f32.mrb[53].mxu0 }
 0x14f   :  { %v630_v62 = vadd.f32 %v2882_v38, %v629_v61  ;;  %v2432_v63 = vpop.f32.mrb[54].mxu0 }
 0x150   :  { %v641_v0 = vadd.f32 %v2432_v63, %v2882_v38  ;;  %v632_v1 = vpop.f32.mrb[55].mxu0  ;;  %v730_v3 = vmax.f32 %v638_v60, 0.0  ;;  %v2687_v63 = vld [vmem:[%s3121_s5 + $0x30] sm:$0xff]  }
 0x151   :  { %v633_v2 = vadd.f32 %v2882_v38, %v632_v1  ;;  %v728_v5 = vmax.f32 %v630_v62, 0.0  ;;  %v2688_v1 = vld [vmem:[%s3121_s5 + $0x38] sm:$0xff]  }
 0x152   :  { %v731_v4 = vmax.f32 %v641_v0, 0.0 }
 0x153   :  { %v729_v6 = vmax.f32 %v633_v2, 0.0  ;;  %v2689_v2 = vld [vmem:[%s3121_s5 + $0x20] sm:$0xff]  }
 0x154   :  { %v767_v7 = vpack.c.bf16 %v731_v4, %v730_v3  ;;  %v2690_v4 = vld [vmem:[%s3121_s5 + $0x28] sm:$0xff]  }
 0x155   :  { %v766_v8 = vpack.c.bf16 %v729_v6, %v728_v5  ;;  %v2435_v9 = vpop.f32.mrb[56].mxu0 }
 0x156   :  { %v654_v10 = vadd.f32 %v2435_v9, %v2882_v38  ;;  %v645_v11 = vpop.f32.mrb[57].mxu0 }
 0x157   :  { %v646_v15 = vadd.f32 %v2882_v38, %v645_v11  ;;  %v2436_v20 = vpop.f32.mrb[58].mxu0  ;;  %2479 = vmatprep.mubr.msk.bf16.mxu1 %vm783_vm1, %v766_v8 }
 0x158   :  { %v657_v21 = vadd.f32 %v2436_v20, %v2882_v38  ;;  %v648_v22 = vpop.f32.mrb[59].mxu0  ;;  %2480 = vmatmul.mubr.msk.bf16.vlgmr.msra.gmra.mrb[0].mxu1 %vm783_vm1, %v767_v7  ;;  %v734_v24 = vmax.f32 %v654_v10, 0.0 }
 0x159   :  { %v649_v23 = vadd.f32 %v2882_v38, %v648_v22  ;;  %2484 = vmatpush3.bf16.msra.mxu1 %v2674_v37  ;;  %v732_v26 = vmax.f32 %v646_v15, 0.0 }
 0x15a   :  { %v735_v25 = vmax.f32 %v657_v21, 0.0  ;;  %2489 = vmatprep.subr.bf16.mxu1 %v2675_v12 }
 0x15b   :  { %v733_v27 = vmax.f32 %v649_v23, 0.0 }
 0x15c   :  { %v769_v28 = vpack.c.bf16 %v735_v25, %v734_v24 }
 0x15d   :  { %v768_v29 = vpack.c.bf16 %v733_v27, %v732_v26  ;;  %v2439_v30 = vpop.f32.mrb[60].mxu0 }
 0x15e   :  { %v670_v31 = vadd.f32 %v2439_v30, %v2882_v38  ;;  %v661_v32 = vpop.f32.mrb[61].mxu0 }
 0x15f   :  { %v662_v33 = vadd.f32 %v2882_v38, %v661_v32  ;;  %v2440_v34 = vpop.f32.mrb[62].mxu0 }
 0x160   :  { %v673_v35 = vadd.f32 %v2440_v34, %v2882_v38  ;;  %v664_v36 = vpop.f32.mrb[63].mxu0  ;;  %v738_v37 = vmax.f32 %v670_v31, 0.0 }
 0x161   :  { %v665_v39 = vadd.f32 %v2882_v38, %v664_v36  ;;  %v736_v41 = vmax.f32 %v662_v33, 0.0  ;;  %v2677_v38 = vld [vmem:[%s3119_s3 + $0x20] sm:$0xff]  }
 0x162   :  { %v739_v40 = vmax.f32 %v673_v35, 0.0 }
 0x163   :  { %v737_v42 = vmax.f32 %v665_v39, 0.0 }
 0x164   :  { %v771_v43 = vpack.c.bf16 %v739_v40, %v738_v37 }
 0x165   :  { %v770_v44 = vpack.c.bf16 %v737_v42, %v736_v41 }
 0x167   :  { %2485 = vmatprep.mubr.msk.bf16.mxu1 %vm783_vm1, %v770_v44 }
 0x168   :  { %2486 = vmatmul.mubr.msk.bf16.vlgmr.msra.gmra.mrb[0].mxu1 %vm783_vm1, %v771_v43 }
 0x169   :  { %2490 = vmatpush3.bf16.msra.mxu1 %v2675_v12  ;;  %2491 = vmatprep.mubr.msk.bf16.mxu1 %vm783_vm1, %v2890_v52  ;;  %v2680_v52 = vld [vmem:[%s3119_s3 + $0x50] sm:$0xff]  }
 0x16a   :  { %2495 = vmatprep.subr.bf16.mxu1 %v2676_v50 }
 0x174   :  { %2492 = vmatmul.mubr.msk.bf16.vlgmr.msra.gmra.mrb[0].mxu1 %vm783_vm1, %v2888_v51  ;;  %v2679_v51 = vld [vmem:[%s3119_s3 + $0x40] sm:$0xff]  }
 0x175   :  { %2496 = vmatpush3.bf16.msra.mxu1 %v2676_v50  ;;  %2497 = vmatprep.mubr.msk.bf16.mxu1 %vm783_vm1, %v2907_v17  ;;  %v2682_v17 = vld [vmem:[%s3119_s3 + $0x70] sm:$0xff]  }
 0x176   :  { %2501 = vmatprep.subr.bf16.mxu1 %v2677_v38 }
 0x180   :  { %2498 = vmatmul.mubr.msk.bf16.vlgmr.msra.gmra.mrb[0].mxu1 %vm783_vm1, %v2905_v16  ;;  %v2681_v16 = vld [vmem:[%s3119_s3 + $0x60] sm:$0xff]  }
 0x181   :  { %2502 = vmatpush3.bf16.msra.mxu1 %v2677_v38  ;;  %2503 = vmatprep.mubr.msk.bf16.mxu1 %vm783_vm1, %v2924_v47  ;;  %v2686_v47 = vld [vmem:[%s3121_s5 + $0x18] sm:$0xff]  }
 0x182   :  { %2507 = vmatprep.subr.bf16.mxu1 %v2678_v53 }
 0x18c   :  { %2504 = vmatmul.mubr.msk.bf16.vlgmr.msra.gmra.mrb[0].mxu1 %vm783_vm1, %v2922_v46  ;;  %v2685_v46 = vld [vmem:[%s3121_s5 + $0x10] sm:$0xff]  }
 0x18d   :  { %2508 = vmatpush3.bf16.msra.mxu1 %v2678_v53  ;;  %2509 = vmatprep.mubr.msk.bf16.mxu1 %vm783_vm1, %v2941_v14 }
 0x18e   :  { %2513 = vmatprep.subr.bf16.mxu1 %v2679_v51 }
 0x198   :  { %2510 = vmatmul.mubr.msk.bf16.vlgmr.msra.gmra.mrb[0].mxu1 %vm783_vm1, %v2939_v13  ;;  %v2247_v13 = vld [vmem:[%s3122_s4] ss:$0 sm:$0xff] }
 0x199   :  { %2514 = vmatpush3.bf16.msra.mxu1 %v2679_v51  ;;  %2515 = vmatprep.mubr.msk.bf16.mxu1 %vm783_vm1, %v2958_v48 }
 0x19a   :  { %2519 = vmatprep.subr.bf16.mxu1 %v2680_v52 }
 0x1a4   :  { %2516 = vmatmul.mubr.msk.bf16.vlgmr.msra.gmra.mrb[0].mxu1 %vm783_vm1, %v2956_v45 }
 0x1a5   :  { %2520 = vmatpush3.bf16.msra.mxu1 %v2680_v52  ;;  %2521 = vmatprep.mubr.msk.bf16.mxu1 %vm783_vm1, %v2975_v19 }
 0x1a6   :  { %2525 = vmatprep.subr.bf16.mxu1 %v2681_v16 }
 0x1b0   :  { %2522 = vmatmul.mubr.msk.bf16.vlgmr.msra.gmra.mrb[0].mxu1 %vm783_vm1, %v2973_v18 }
 0x1b1   :  { %2526 = vmatpush3.bf16.msra.mxu1 %v2681_v16  ;;  %2527 = vmatprep.mubr.msk.bf16.mxu1 %vm783_vm1, %v3000_v58 }
 0x1b2   :  { %2531 = vmatprep.subr.bf16.mxu1 %v2682_v17 }
 0x1bc   :  { %2528 = vmatmul.mubr.msk.bf16.vlgmr.msra.gmra.mrb[0].mxu1 %vm783_vm1, %v2997_v57 }
 0x1bd   :  { %2532 = vmatpush3.bf16.msra.mxu1 %v2682_v17  ;;  %2533 = vmatprep.mubr.msk.bf16.mxu1 %vm783_vm1, %v768_v29 }
 0x1be   :  { %2537 = vmatprep.subr.bf16.mxu1 %v2691_v49 }
 0x1c8   :  { %2534 = vmatmul.mubr.msk.bf16.vlgmr.msra.gmra.mrb[0].mxu1 %vm783_vm1, %v769_v28 }
 0x1c9   :  { %2538 = vmatpush3.bf16.msra.mxu1 %v2685_v46  ;;  %2541 = vmatprep.mubr.msk.bf16.mxu1 %vm2692_vm2, %v2691_v49 }
 0x1ca   :  { %2539 = vmatprep.subr.bf16.mxu1 %v2691_v49 }
 0x1cd   :  { %2540 = vmatpush3.bf16.msra.mxu1 %v2686_v47 }
 0x1ce   :  { %2545 = vmatprep.subr.bf16.mxu1 %v2691_v49 }
 0x29b   :  { %v2535_v14 = vpop.f32.mrb[0].mxu1 }
 0x29c   :  { %v1833_v45 = vadd.f32 %v2535_v14, %v2247_v13  ;;  %v1781_v48 = vpop.f32.mrb[1].mxu1 }
 0x29d   :  { %v1831_v18 = vadd.f32 %v2247_v13, %v1781_v48  ;;  %v2536_v19 = vpop.f32.mrb[2].mxu1 }
 0x29e   :  { %v1834_v54 = vadd.f32 %v2536_v19, %v2247_v13  ;;  %v1784_v55 = vpop.f32.mrb[3].mxu1  ;;  %v1837_v57 = vmax.f32 %v1833_v45, 0.0 }
 0x29f   :  { %v1832_v56 = vadd.f32 %v2247_v13, %v1784_v55  ;;  %v1835_v59 = vmax.f32 %v1831_v18, 0.0 }
 0x2a0   :  { %v1838_v58 = vmax.f32 %v1834_v54, 0.0 }
 0x2a1   :  { %v1836_v60 = vmax.f32 %v1832_v56, 0.0 }
 0x2a2   :  { %v1840_v61 = vpack.c.bf16 %v1838_v58, %v1837_v57 }
 0x2a3   :  { %v1839_v62 = vpack.c.bf16 %v1836_v60, %v1835_v59 }
 0x2a4   :  { %v1919_v3 = vrot.slane %v1840_v61, 4 }
 0x2a5   :  { %v1851_v0 = vrot.slane %v1839_v62, 4  ;;  %2558 = vmatmul.mubr.msk.bf16.vlgmr.msra.gmra.mrb[64].mxu0 %vm1864_vm3, %v1839_v62 }
 0x2a7   :  { %2542 = vmatmul.mubr.msk.bf16.vlgmr.msra.gmra.mrb[4].mxu1 %vm1864_vm3, %v1851_v0 }
 0x2a8   :  { %2546 = vmatpush3.bf16.msra.mxu1 %v2687_v63  ;;  %2549 = vmatprep.mubr.msk.bf16.mxu1 %vm2692_vm2, %v2691_v49 }
 0x2a9   :  { %2547 = vmatprep.subr.bf16.mxu1 %v2691_v49 }
 0x2ac   :  { %2548 = vmatpush3.bf16.msra.mxu1 %v2688_v1 }
 0x2ad   :  { %2561 = vmatprep.subr.bf16.mxu1 %v2691_v49 }
 0x2af   :  { %2550 = vmatmul.mubr.msk.bf16.vlgmr.msra.gmra.mrb[8].mxu1 %vm1864_vm3, %v1919_v3 }
 0x2b0   :  { %2562 = vmatpush3.bf16.msra.mxu1 %v2689_v2  ;;  %2565 = vmatprep.mubr.msk.bf16.mxu1 %vm2692_vm2, %v2691_v49 }
 0x2b1   :  { %2563 = vmatprep.subr.bf16.mxu1 %v2691_v49  ;;  %v2272_v49 = vld [vmem:[%s3123_s6] ss:$0 sm:$0xff] }
 0x2b4   :  { %2564 = vmatpush3.bf16.msra.mxu1 %v2690_v4 }
 0x2b7   :  { %2566 = vmatmul.mubr.msk.bf16.vlgmr.msra.gmra.mrb[12].mxu1 %vm1864_vm3, %v1840_v61 }
 0x378   :  { %v2024_v5 = vpop.f32.mrb[64].mxu0 }
 0x379   :  { %v2559_v6 = vpop.f32.mrb[65].mxu0 }
 0x37a   :  { %v1902_v7 = vpop.f32.mrb[4].mxu1  ;;  %v2027_v8 = vpop.f32.mrb[66].mxu0 }
 0x37b   :  { %v2025_v9 = vadd.f32 %v2024_v5, %v1902_v7  ;;  %v2543_v10 = vpop.f32.mrb[5].mxu1  ;;  %v2560_v11 = vpop.f32.mrb[67].mxu0 }
 0x37c   :  { %v1905_v12 = vpop.f32.mrb[6].mxu1 }
 0x37d   :  { %v2544_v15 = vpop.f32.mrb[7].mxu1 }
 0x382   :  { %v1969_v20 = vpop.f32.mrb[8].mxu1 }
 0x383   :  { %v2551_v21 = vpop.f32.mrb[9].mxu1 }
 0x384   :  { %v1972_v22 = vpop.f32.mrb[10].mxu1 }
 0x385   :  { %v2552_v23 = vpop.f32.mrb[11].mxu1 }
 0x38a   :  { %v2079_v24 = vpop.f32.mrb[12].mxu1 }
 0x38b   :  { %v2080_v25 = vadd.f32 %v2079_v24, %v1969_v20  ;;  %v2567_v26 = vpop.f32.mrb[13].mxu1 }
 0x38c   :  { %v2082_v27 = vpop.f32.mrb[14].mxu1 }
 0x38d   :  { %v2085_v28 = vadd.f32 %v2080_v25, %v2025_v9  ;;  %v2568_v29 = vpop.f32.mrb[15].mxu1 }
 0x38f   :  { %v2093_v30 = vadd.f32 %v2272_v49, %v2085_v28 }
 0x391   :  { %v2094_v31 = vmax.f32 %v2093_v30, 0.0 }
 0x393   :  { %2095 = vst [vmem:[%s3124_s7] sm:$0xff] %v2094_v31 }

</bundles_post_ra>
